<compile_context>
chip_gen: v7x
topology: tpu7x:2x2x1
jax: 0.10.0
libtpu: 0.0.40
codegen_flags: <defaults>
</compile_context>

<pallas_src>
import math

import jax
import jax.numpy as jnp
from jax.experimental import pallas as pl
from jax.experimental.pallas import tpu as pltpu

_GELU_C = math.sqrt(2.0 / math.pi)
_N_OUT_PAD = 128  # lane-dense output width


def _classifier_kernel(x_ref, wt_ref, b_ref, o_ref):
    x = x_ref[...]
    # tanh-approximation GELU, exactly matching the PyTorch `gelu` module.
    x3 = x * x * x  # explicit VPU muls (avoid pow lowering)
    g = 0.5 * x * (1.0 + jnp.tanh(_GELU_C * (x + 0.044715 * x3)))
    # fc2: [TB, Z] @ [Z, 128] + [1, 128]   (lane-dense output tile)
    o_ref[...] = (
        jnp.dot(g, wt_ref[...], preferred_element_type=jnp.float32) + b_ref[...]
    ).astype(o_ref.dtype)


def multi_classifier_mnist(x, w, b, *, tb=512):
    """x: [B, Z] float32, w: [10, Z] (PyTorch Linear layout), b: [10]."""
    B, Z = x.shape
    n_out = w.shape[0]

    # Pad the output/lane dimension 10 -> 128 with zeros and pre-transpose the
    # weight to [Z, 128] so the in-kernel matmul needs no transpose and the
    # output store is unmasked.
    # TODO(synk): in a real model, store the fc2 weight pre-transposed/padded
    # once instead of doing it per call.
    wt = jnp.zeros((Z, _N_OUT_PAD), x.dtype).at[:, :n_out].set(w.T)
    b2 = jnp.zeros((1, _N_OUT_PAD), x.dtype).at[:, :n_out].set(b)

    # Batch tiling: single full-dim block for small B, otherwise tiles of `tb`
    # rows (multiple of 8 sublanes) with zero-padding of the ragged remainder.
    tb = max(8, (tb // 8) * 8)
    if B <= tb:
        tb_eff, b_pad = B, B
    else:
        tb_eff = tb
        b_pad = pl.cdiv(B, tb) * tb
    x_pad = x if b_pad == B else jnp.pad(x, ((0, b_pad - B), (0, 0)))

    out = pl.pallas_call(
        _classifier_kernel,
        out_shape=jax.ShapeDtypeStruct((b_pad, _N_OUT_PAD), jnp.float32),
        grid_spec=pltpu.PrefetchScalarGridSpec(
            num_scalar_prefetch=0,
            grid=(b_pad // tb_eff,),
            in_specs=[
                pl.BlockSpec((tb_eff, Z), lambda i: (i, 0)),
                pl.BlockSpec((Z, _N_OUT_PAD), lambda i: (0, 0)),
                pl.BlockSpec((1, _N_OUT_PAD), lambda i: (0, 0)),
            ],
            out_specs=pl.BlockSpec((tb_eff, _N_OUT_PAD), lambda i: (i, 0)),
        ),
        compiler_params=pltpu.CompilerParams(
            dimension_semantics=("parallel",),      # shards across TCs on v7x
            vmem_limit_bytes=48 * 1024 * 1024,      # safe on v5e/v6e/v7x
        ),
    )(x_pad, wt, b2)

    return out[:B, :n_out]


if __name__ == "__main__":
    key = jax.random.PRNGKey(0)
    k_x, k_w, k_b = jax.random.split(key, 3)

    B = 2          # batch
    Z = 32         # args.z_dim
    N_OUT = 10     # MNIST classes

    x = jax.random.normal(k_x, (B, Z), dtype=jnp.float32)

    # Deterministic nn.Linear-style init: U(-1/sqrt(Z), 1/sqrt(Z))
    bound = 1.0 / math.sqrt(Z)
    w = jax.random.uniform(k_w, (N_OUT, Z), minval=-bound, maxval=bound,
                           dtype=jnp.float32)
    b = jax.random.uniform(k_b, (N_OUT,), minval=-bound, maxval=bound,
                           dtype=jnp.float32)

    def ref_fn(xx):
        g = 0.5 * xx * (1.0 + jnp.tanh(_GELU_C * (xx + 0.044715 * xx ** 3)))
        return g @ w.T + b

    # Small-shape path (single block, full-dim).
    out = multi_classifier_mnist(x, w, b)
    jax.block_until_ready(out)
    assert out.shape == (B, N_OUT)
    assert jnp.allclose(out, ref_fn(x), atol=1e-5, rtol=1e-5)

    # Exercise the gridded / ragged-batch path cheaply (B=20, tile=8).
    x_big = jax.random.normal(k_x, (20, Z), dtype=jnp.float32)
    out_big = multi_classifier_mnist(x_big, w, b, tb=8)
    jax.block_until_ready(out_big)
    assert out_big.shape == (20, N_OUT)
    assert jnp.allclose(out_big, ref_fn(x_big), atol=1e-5, rtol=1e-5)

    print("KERNEL_OK")
</pallas_src>

<mosaic_0001>
module attributes {stable_mosaic.version = 11 : i64} {
  func.func @_classifier_kernel(%arg0: i32, %arg1: memref<2x32xf32, #tpu.memory_space<vmem>>, %arg2: memref<32x128xf32, #tpu.memory_space<vmem>>, %arg3: memref<1x128xf32, #tpu.memory_space<vmem>>, %arg4: memref<2x128xf32, #tpu.memory_space<vmem>>) attributes {dimension_semantics = [#tpu.dimension_semantics<parallel>], iteration_bounds = array<i64: 1>, scalar_prefetch = 0 : i64, scratch_operands = 0 : i64, tpu.core_type = #tpu.core_type<tc>, window_params = [{transform_indices = @transform_0, window_bounds = array<i64: 2, 32>}, {pipeline_mode = #tpu.pipeline_mode<synchronous>, transform_indices = @transform_1, window_bounds = array<i64: 32, 128>}, {pipeline_mode = #tpu.pipeline_mode<synchronous>, transform_indices = @transform_2, window_bounds = array<i64: 1, 128>}, {transform_indices = @transform_3, window_bounds = array<i64: 2, 128>}]} {
    %c0 = arith.constant 0 : index
    %c0_0 = arith.constant 0 : index
    %0 = vector.load %arg1[%c0, %c0_0] : memref<2x32xf32, #tpu.memory_space<vmem>>, vector<2x32xf32>
    %1 = arith.mulf %0, %0 : vector<2x32xf32>
    %2 = arith.mulf %1, %0 : vector<2x32xf32>
    %cst = arith.constant 5.000000e-01 : f32
    %3 = vector.broadcast %cst : f32 to vector<2x32xf32>
    %4 = arith.mulf %3, %0 : vector<2x32xf32>
    %cst_1 = arith.constant 4.471500e-02 : f32
    %5 = vector.broadcast %cst_1 : f32 to vector<2x32xf32>
    %6 = arith.mulf %5, %2 : vector<2x32xf32>
    %7 = arith.addf %0, %6 : vector<2x32xf32>
    %cst_2 = arith.constant 0.797884583 : f32
    %8 = vector.broadcast %cst_2 : f32 to vector<2x32xf32>
    %9 = arith.mulf %8, %7 : vector<2x32xf32>
    %10 = math.tanh %9 : vector<2x32xf32>
    %cst_3 = arith.constant 1.000000e+00 : f32
    %11 = vector.broadcast %cst_3 : f32 to vector<2x32xf32>
    %12 = arith.addf %11, %10 : vector<2x32xf32>
    %13 = arith.mulf %4, %12 : vector<2x32xf32>
    %c0_4 = arith.constant 0 : index
    %c0_5 = arith.constant 0 : index
    %14 = vector.load %arg2[%c0_4, %c0_5] : memref<32x128xf32, #tpu.memory_space<vmem>>, vector<32x128xf32>
    %cst_6 = arith.constant dense<0.000000e+00> : vector<2x128xf32>
    %15 = tpu.matmul %13, %14, %cst_6 {dimension_numbers = #tpu.dot_dimension_numbers<[1], [0], [0], [1], [0, 0, 1, 1], [], []>} : vector<2x32xf32>, vector<32x128xf32>, vector<2x128xf32> -> vector<2x128xf32>
    %c0_7 = arith.constant 0 : index
    %c0_8 = arith.constant 0 : index
    %16 = vector.load %arg3[%c0_7, %c0_8] : memref<1x128xf32, #tpu.memory_space<vmem>>, vector<1x128xf32>
    %17 = vector.broadcast %16 : vector<1x128xf32> to vector<2x128xf32>
    %18 = arith.addf %15, %17 : vector<2x128xf32>
    %c0_9 = arith.constant 0 : index
    %c0_10 = arith.constant 0 : index
    %19 = vector.load %arg4[%c0_9, %c0_10] : memref<2x128xf32, #tpu.memory_space<vmem>>, vector<2x128xf32>
    tpu.vector_store %arg4[%c0_9, %c0_10], %18 {strides = array<i32>} : memref<2x128xf32, #tpu.memory_space<vmem>>, vector<2x128xf32>,
    return
  }
  func.func @transform_0(%arg0: i32) -> (i32, i32) {
    %c0_i32 = arith.constant 0 : i32
    %c0_i32_0 = arith.constant 0 : i32
    return %arg0, %c0_i32 : i32, i32
  }
  func.func @transform_1(%arg0: i32) -> (i32, i32) {
    %c0_i32 = arith.constant 0 : i32
    %c0_i32_0 = arith.constant 0 : i32
    %c0_i32_1 = arith.constant 0 : i32
    return %c0_i32, %c0_i32_0 : i32, i32
  }
  func.func @transform_2(%arg0: i32) -> (i32, i32) {
    %c0_i32 = arith.constant 0 : i32
    %c0_i32_0 = arith.constant 0 : i32
    %c0_i32_1 = arith.constant 0 : i32
    return %c0_i32, %c0_i32_0 : i32, i32
  }
  func.func @transform_3(%arg0: i32) -> (i32, i32) {
    %c0_i32 = arith.constant 0 : i32
    %c0_i32_0 = arith.constant 0 : i32
    return %arg0, %c0_i32 : i32, i32
  }
}

</mosaic_0001>

<bundles_post_ra>
// kernel: tpu_custom_call.1
= control target key start
LH: loop header
LB: loop body
LE: loop exit
PB: predicated region body
PF: predicated region fallthrough
CT: control target
= control target key end

     0   :  { %8 = vsyncpa [#allocation3], 0  ;;  %s333_s0 = inlined_call_operand.hbm [shape: f32[2,32], index: 0, kind: input, shape index: {}]   ;;  %s334_s1 = inlined_call_operand.hbm [shape: f32[32,128], index: 1, kind: input, shape index: {}]   ;;  %s335_s2 = inlined_call_operand.vmem [shape: f32[1,128], index: 2, kind: input, shape index: {}]   ;;  %s336_s3 = inlined_call_operand.hbm [shape: f32[2,128], index: 3, kind: output, shape index: {}]  }
   0x1   :  { %9 = vsyncpa [#allocation6], 0 }
   0x2   :  { %10 = vsyncpa [#allocation4], 0  ;;  %s259_s12 = smov [#allocation2]   ;;  %s260_s14 = smov [#allocation5]  }
   0x3   :  { %s17_s13 = sshll.u32 %s259_s12, 4  ;;  %s26_s15 = sshll.u32 %s260_s14, 4  ;;  %s18_s13 = int_to_ptr.vmem [resolvable:$true] %s17_s13  ;;  %s287_s15 = int_to_ptr.vmem [resolvable:$true] %s26_s15 }
   0x4   :  { %s187_s18 = scalar_lea.hbm %s333_s0, 32 }
   0x5   :  { %p188_p0 = scmp.ne.s32.totalorder %s333_s0, %s187_s18  ;;  %p191_p1 = scmp.lt.u32.totalorder %s187_s18, %s333_s0 }
   0x7   :  { %p193_p2 = pnand %p191_p1, %p188_p0 }
   0x9   :  { %196 = shalt.err (!%p193_p2)
}
   0xa   :  { %s197_s23 = scalar_lea.vmem %s18_s13, 32  ;;  %p202_p4 = scmp.lt.s32.totalorder %s18_s13, %s18_s13 }
   0xb   :  { %p198_p3 = scmp.ne.s32.totalorder %s18_s13, %s197_s23  ;;  %p203_p5 = scmp.lt.s32.totalorder %s197_s23, %s197_s23 }
   0xd   :  { %p204_p6 = por %p203_p5, %p202_p4 }
   0xf   :  { %p205_p7 = pnand %p204_p6, %p198_p3 }
  0x11   :  { %208 = shalt.err (!%p205_p7)
}
  0x12   :  { %20 = dma.hbm_to_vmem [thread:$0]  %s333_s0, 32, %s18_s13, [#allocation3]  }
  0x13   :  { %s209_s28 = scalar_lea.hbm %s334_s1, 512 }
  0x14   :  { %p210_p8 = scmp.ne.s32.totalorder %s334_s1, %s209_s28  ;;  %p213_p9 = scmp.lt.u32.totalorder %s209_s28, %s334_s1 }
  0x16   :  { %p215_p10 = pnand %p213_p9, %p210_p8 }
  0x18   :  { %218 = shalt.err (!%p215_p10)
}
  0x19   :  { %s219_s6 = scalar_lea.vmem %s287_s15, 512  ;;  %p224_p12 = scmp.lt.s32.totalorder %s287_s15, %s287_s15 }
  0x1a   :  { %p220_p11 = scmp.ne.s32.totalorder %s287_s15, %s219_s6  ;;  %p225_p13 = scmp.lt.s32.totalorder %s219_s6, %s219_s6 }
  0x1c   :  { %p226_p0 = por %p225_p13, %p224_p12 }
  0x1e   :  { %p227_p1 = pnand %p226_p0, %p220_p11 }
  0x20   :  { %230 = shalt.err (!%p227_p1)
}
  0x21   :  { %s261_s0 = smov 128   ;;  %s262_s7 = smov 8  }
  0x22   :  { %32 = dma.hbm_to_vmem [thread:$0]  %s334_s1, 512, %s287_s15, [#allocation6], %s261_s0, %s261_s0, %s262_s7  }
  0x23   :  { %253 = dma.done.wait [#allocation3], 32  }
  0x24   :  { %254 = vsyncadd [#allocation3], 4294967264 }
  0x25   :  { %255 = dma.done.wait [#allocation6], 512  }
  0x26   :  { %256 = vsyncadd [#allocation6], 4294966784  ;;  %v263_v0 = vmov 0.0|0.0   ;;  %vm264_vm0 = vmmov 0   ;;  %v265_v1 = vmov 0.0   ;;  %v51_v2 = vld [vmem:[#allocation5] sm:$0xff] }
  0x27   :  { %171 = vmatprep.subr.bf16.mxu0 %v263_v0  ;;  %168 = vmatprep.mubr.msk.f32.mxu0 %vm264_vm0, %v265_v1  ;;  %v52_v3 = vld [vmem:[#allocation5 + $0x8] sm:$0xff]  ;;  %v53_v4 = vld [vmem:[#allocation5 + $0x10] sm:$0xff]  ;;  %v54_v6 = vld [vmem:[#allocation5 + $0x18] sm:$0xff]  ;;  %vm62_vm1 = vcmask 261120   ;;  %s266_s11 = smov [#allocation7]  }
  0x28   :  { %v172_v5 = vpack.c.bf16 %v52_v3, %v51_v2  ;;  %v41_v7 = vld [vmem:[#allocation2] sm:$0x3]  ;;  %v175_v9 = vpack.c.bf16 %v54_v6, %v53_v4  ;;  %s143_s12 = sshll.u32 %s266_s11, 4  ;;  %s144_s12 = int_to_ptr.vmem [resolvable:$true] %s143_s12 }
  0x29   :  { %v42_v8 = vmul.f32 %v41_v7, %v41_v7  ;;  %v44_v14 = vmul.f32 0.5, %v41_v7  ;;  %v153_v18 = vld [vmem:[%s335_s2] ss:$0 sm:$0xff]  ;;  %s231_s13 = scalar_lea.vmem %s144_s12, 32  ;;  %p236_p3 = scmp.lt.s32.totalorder %s144_s12, %s144_s12 }
  0x2a   :  { %173 = vmatpush3.bf16.msra.mxu0 %v172_v5  ;;  %p232_p2 = scmp.ne.s32.totalorder %s144_s12, %s231_s13  ;;  %p237_p4 = scmp.lt.s32.totalorder %s231_s13, %s231_s13 }
  0x2b   :  { %174 = vmatprep.subr.bf16.mxu0 %v263_v0  ;;  %v43_v10 = vmul.f32 %v42_v8, %v41_v7 }
  0x2c   :  { %p238_p5 = por %p237_p4, %p236_p3 }
  0x2d   :  { %v45_v11 = vmul.f32 0.044715, %v43_v10 }
  0x2e   :  { %176 = vmatpush3.bf16.msra.mxu0 %v175_v9  ;;  %p239_p6 = pnand %p238_p5, %p232_p2 }
  0x2f   :  { %v46_v12 = vadd.f32 %v45_v11, %v41_v7 }
  0x31   :  { %v47_v13 = vmul.f32 0.7978846, %v46_v12 }
  0x33   :  { %185 = vtanh.f32 %v47_v13 }
  0x3d   :  { %v186_v15 = vpop.eup %185 }
  0x3e   :  { %v49_v16 = vadd.f32 1.0, %v186_v15 }
  0x40   :  { %v50_v17 = vmul.f32 %v49_v16, %v44_v14 }
  0x42   :  { %169 = vmatmul.mubr.msk.f32.vlgmr.msra.gmra.mrb[0].mxu0 %vm62_vm1, %v50_v17 }
 0x115   :  { %v132_v19 = vpop.f32.mrb[0].mxu0 }
 0x116   :  { %v133_v20 = vadd.f32 %v153_v18, %v132_v19  ;;  %v170_v21 = vpop.f32.mrb[1].mxu0 }
 0x118   :  { %136 = vst [vmem:[#allocation7] sm:$0x3] %v133_v20 }
 0x119   :  { %242 = shalt.err (!%p239_p6)
}
 0x11a   :  { %s243_s16 = scalar_lea.hbm %s336_s3, 32 }
 0x11b   :  { %p244_p7 = scmp.ne.s32.totalorder %s336_s3, %s243_s16  ;;  %p247_p8 = scmp.lt.u32.totalorder %s243_s16, %s336_s3 }
 0x11d   :  { %p249_p9 = pnand %p247_p8, %p244_p7 }
 0x11f   :  { %252 = shalt.err (!%p249_p9)
}
 0x120   :  { %146 = dma.vmem_to_hbm [thread:$0]  %s144_s12, 32, %s336_s3, [#allocation4]  }
 0x121   :  { %257 = dma.done.wait [#allocation4], 32  }
 0x122   :  { %258 = vsyncadd [#allocation4], 4294967264 }
 0x123   :  { %150 = vsyncpa [#allocation3], 1 }
 0x124   :  { %151 = vsyncpa [#allocation6], 1 }
 0x125   :  { %152 = vsyncpa [#allocation4], 1 }

</bundles_post_ra>
